<compile_context>
chip_gen: v6e
topology: v6e:2x2x1
jax: 0.10.0
libtpu: 0.0.40
codegen_flags: <defaults>
</compile_context>

<pallas_src>
import math

import jax
import jax.numpy as jnp
from jax.experimental import pallas as pl
from jax.experimental.pallas import tpu as pltpu


def _embedding_kernel(x_ref, w1t_ref, b1_ref, w2t_ref, b2_ref, o_ref):
    # x_ref  : (C_in, TILE_COLS)   channels-first pixel slab
    # w1t_ref: (C_mid, C_in)       b1_ref: (C_mid, 1)
    # w2t_ref: (C_out, C_mid)      b2_ref: (C_out, 1)
    # o_ref  : (C_out, TILE_COLS)  lane-dense output block
    # --- layer 1 (cnn1): 1x1 conv + ReLU, MXU matmul, f32 accumulate ---
    h = jnp.dot(w1t_ref[...], x_ref[...], preferred_element_type=jnp.float32)
    h = jnp.maximum(h + b1_ref[...], 0.0)
    # --- layer 2 (cnn2): 1x1 conv + ReLU, MXU matmul, f32 accumulate ---
    y = jnp.dot(w2t_ref[...], h, preferred_element_type=jnp.float32)
    y = jnp.maximum(y + b2_ref[...], 0.0)
    o_ref[...] = y.astype(o_ref.dtype)


def embedding_forward(x_nchw, w1, b1, w2, b2, *, tile_cols=2048,
                      out_dtype=jnp.float32):
    """x_nchw: (N, C_in, V, T) f32. w1: (C_in, C_mid), b1: (C_mid,),
    w2: (C_mid, C_out), b2: (C_out,). Returns (N, C_out, V, T) in out_dtype.

    out_dtype=jnp.bfloat16 halves HBM writeback (the dominant traffic on
    v5e, ~256 B written vs ~12 B read per pixel); keep f32 when downstream
    needs full precision.
    """
    N, C_in, V, T = x_nchw.shape
    C_mid = w1.shape[1]
    C_out = w2.shape[1]
    cols = V * T

    # Channels-first flatten: free reshape (contiguous), no transpose, no pad.
    x_cf = x_nchw.reshape(N, C_in, cols)

    # Lane-dense column tile: multiple of 128, no larger than the padded width.
    padded_cols = pl.cdiv(cols, 128) * 128
    tc = min(max(int(tile_cols), 128), padded_cols)
    tc = pl.cdiv(tc, 128) * 128
    num_col_tiles = pl.cdiv(cols, tc)

    # v7x shards "parallel" grid axes across its 2 TensorCores: never hand it a
    # 1x1 grid.  If the whole problem collapsed into one step, split the column
    # axis in two so the second core gets work.
    if N * num_col_tiles < 2 and padded_cols >= 256:
        tc = pl.cdiv(pl.cdiv(cols, 2), 128) * 128
        num_col_tiles = pl.cdiv(cols, tc)

    # Output-channels-first weights; biases as column vectors.
    w1t = jnp.transpose(w1)               # (C_mid, C_in)
    w2t = jnp.transpose(w2)               # (C_out, C_mid)
    b1c = jnp.reshape(b1, (C_mid, 1))
    b2c = jnp.reshape(b2, (C_out, 1))

    # VMEM budget per step (budgeted against v7x: 64 MiB physical / 32 MiB
    # default scoped limit).  Only raise the scoped limit if a large tile
    # actually needs it; default tiles stay far below.
    out_bytes = jnp.dtype(out_dtype).itemsize
    c_in_pad = pl.cdiv(C_in, 8) * 8
    vmem_est = (2 * C_out * tc * out_bytes                      # out dbl-buf
                + 2 * c_in_pad * tc * 4                         # in dbl-buf
                + (C_mid + C_out) * tc * 4                      # h / y temps
                + 2 * 4 * (C_mid * C_in + C_mid + C_out * C_mid + C_out))
    compiler_kwargs = dict(dimension_semantics=("parallel", "parallel"))
    if vmem_est * 3 // 2 > (32 << 20):
        compiler_kwargs["vmem_limit_bytes"] = min(vmem_est * 2, 100 << 20)

    out_cf = pl.pallas_call(
        _embedding_kernel,
        out_shape=jax.ShapeDtypeStruct((N, C_out, cols), out_dtype),
        grid_spec=pltpu.PrefetchScalarGridSpec(
            num_scalar_prefetch=0,
            # Column axis innermost: constant-index weight/bias blocks stay
            # resident across every column tile of a sample.
            grid=(N, num_col_tiles),
            in_specs=[
                pl.BlockSpec((pl.Squeezed(), C_in, tc), lambda n, c: (n, 0, c)),
                pl.BlockSpec((C_mid, C_in), lambda n, c: (0, 0)),
                pl.BlockSpec((C_mid, 1), lambda n, c: (0, 0)),
                pl.BlockSpec((C_out, C_mid), lambda n, c: (0, 0)),
                pl.BlockSpec((C_out, 1), lambda n, c: (0, 0)),
            ],
            out_specs=pl.BlockSpec((pl.Squeezed(), C_out, tc),
                                   lambda n, c: (n, 0, c)),
        ),
        compiler_params=pltpu.CompilerParams(**compiler_kwargs),
    )(x_cf, w1t, b1c, w2t, b2c)

    # Free reshape back to NCHW: (N, C_out, V*T) -> (N, C_out, V, T).
    return out_cf.reshape(N, C_out, V, T)


def _init_conv1x1_params(key, c_in, c_out):
    """PyTorch Conv2d(k=1) default init (kaiming_uniform_(a=sqrt(5)))
    reduces to U(-1/sqrt(fan_in), 1/sqrt(fan_in)) for both weight and bias."""
    k_w, k_b = jax.random.split(key)
    bound = 1.0 / math.sqrt(c_in)
    w = jax.random.uniform(k_w, (c_in, c_out), jnp.float32, -bound, bound)
    b = jax.random.uniform(k_b, (c_out,), jnp.float32, -bound, bound)
    return w, b


if __name__ == "__main__":
    # Shapes consistent with the SGN skeleton input: (N, C_in, num_point, step)
    N, C_in, V, T = 2, 3, 25, 8
    C_mid, C_out = 64, 64          # inter_channels, out_channels

    key = jax.random.PRNGKey(0)
    k_x, k_1, k_2 = jax.random.split(key, 3)

    x = jax.random.normal(k_x, (N, C_in, V, T), jnp.float32)
    w1, b1 = _init_conv1x1_params(k_1, C_in, C_mid)
    w2, b2 = _init_conv1x1_params(k_2, C_mid, C_out)

    out = embedding_forward(x, w1, b1, w2, b2)
    out = jax.block_until_ready(out)

    # Reference in plain JAX (1x1 conv == channel matmul), highest precision.
    x_rows = jnp.transpose(x, (0, 2, 3, 1)).reshape(-1, C_in)
    ref = jnp.maximum(
        jnp.dot(x_rows, w1, precision=jax.lax.Precision.HIGHEST) + b1, 0.0)
    ref = jnp.maximum(
        jnp.dot(ref, w2, precision=jax.lax.Precision.HIGHEST) + b2, 0.0)
    ref = jnp.transpose(ref.reshape(N, V, T, C_out), (0, 3, 1, 2))

    assert out.shape == (N, C_out, V, T), out.shape
    assert jnp.allclose(out, ref, atol=1e-4, rtol=1e-4), "mismatch vs reference"

    print("KERNEL_OK")
</pallas_src>

<mosaic_0001>
module attributes {stable_mosaic.version = 11 : i64} {
  func.func @_embedding_kernel(%arg0: i32, %arg1: i32, %arg2: memref<1x3x256xf32, #tpu.memory_space<vmem>>, %arg3: memref<64x3xf32, #tpu.memory_space<vmem>>, %arg4: memref<64x1xf32, #tpu.memory_space<vmem>>, %arg5: memref<64x64xf32, #tpu.memory_space<vmem>>, %arg6: memref<64x1xf32, #tpu.memory_space<vmem>>, %arg7: memref<1x64x256xf32, #tpu.memory_space<vmem>>) attributes {dimension_semantics = [#tpu.dimension_semantics<parallel>, #tpu.dimension_semantics<parallel>], iteration_bounds = array<i64: 2, 1>, scalar_prefetch = 0 : i64, scratch_operands = 0 : i64, tpu.core_type = #tpu.core_type<tc>, window_params = [{transform_indices = @transform_0, window_bounds = array<i64: 1, 3, 256>}, {pipeline_mode = #tpu.pipeline_mode<synchronous>, transform_indices = @transform_1, window_bounds = array<i64: 64, 3>}, {pipeline_mode = #tpu.pipeline_mode<synchronous>, transform_indices = @transform_2, window_bounds = array<i64: 64, 1>}, {pipeline_mode = #tpu.pipeline_mode<synchronous>, transform_indices = @transform_3, window_bounds = array<i64: 64, 64>}, {pipeline_mode = #tpu.pipeline_mode<synchronous>, transform_indices = @transform_4, window_bounds = array<i64: 64, 1>}, {transform_indices = @transform_5, window_bounds = array<i64: 1, 64, 256>}]} {
    %c0 = arith.constant 0 : index
    %c0_0 = arith.constant 0 : index
    %0 = vector.load %arg3[%c0, %c0_0] : memref<64x3xf32, #tpu.memory_space<vmem>>, vector<64x3xf32>
    %c0_1 = arith.constant 0 : index
    %c0_2 = arith.constant 0 : index
    %c0_3 = arith.constant 0 : index
    %1 = vector.load %arg2[%c0_1, %c0_2, %c0_3] : memref<1x3x256xf32, #tpu.memory_space<vmem>>, vector<1x3x256xf32>
    %2 = vector.shape_cast %1 : vector<1x3x256xf32> to vector<3x256xf32>
    %cst = arith.constant dense<0.000000e+00> : vector<64x256xf32>
    %3 = tpu.matmul %0, %2, %cst {dimension_numbers = #tpu.dot_dimension_numbers<[1], [0], [0], [1], [0, 0, 1, 1], [], []>} : vector<64x3xf32>, vector<3x256xf32>, vector<64x256xf32> -> vector<64x256xf32>
    %c0_4 = arith.constant 0 : index
    %c0_5 = arith.constant 0 : index
    %4 = vector.load %arg4[%c0_4, %c0_5] : memref<64x1xf32, #tpu.memory_space<vmem>>, vector<64x1xf32>
    %5 = vector.broadcast %4 : vector<64x1xf32> to vector<64x256xf32>
    %6 = arith.addf %3, %5 : vector<64x256xf32>
    %cst_6 = arith.constant 0.000000e+00 : f32
    %7 = vector.broadcast %cst_6 : f32 to vector<64x256xf32>
    %8 = arith.maximumf %6, %7 : vector<64x256xf32>
    %c0_7 = arith.constant 0 : index
    %c0_8 = arith.constant 0 : index
    %9 = vector.load %arg5[%c0_7, %c0_8] : memref<64x64xf32, #tpu.memory_space<vmem>>, vector<64x64xf32>
    %cst_9 = arith.constant dense<0.000000e+00> : vector<64x256xf32>
    %10 = tpu.matmul %9, %8, %cst_9 {dimension_numbers = #tpu.dot_dimension_numbers<[1], [0], [0], [1], [0, 0, 1, 1], [], []>} : vector<64x64xf32>, vector<64x256xf32>, vector<64x256xf32> -> vector<64x256xf32>
    %c0_10 = arith.constant 0 : index
    %c0_11 = arith.constant 0 : index
    %11 = vector.load %arg6[%c0_10, %c0_11] : memref<64x1xf32, #tpu.memory_space<vmem>>, vector<64x1xf32>
    %12 = vector.broadcast %11 : vector<64x1xf32> to vector<64x256xf32>
    %13 = arith.addf %10, %12 : vector<64x256xf32>
    %cst_12 = arith.constant 0.000000e+00 : f32
    %14 = vector.broadcast %cst_12 : f32 to vector<64x256xf32>
    %15 = arith.maximumf %13, %14 : vector<64x256xf32>
    %c0_13 = arith.constant 0 : index
    %c0_14 = arith.constant 0 : index
    %c0_15 = arith.constant 0 : index
    %16 = vector.load %arg7[%c0_13, %c0_14, %c0_15] : memref<1x64x256xf32, #tpu.memory_space<vmem>>, vector<1x64x256xf32>
    %17 = vector.shape_cast %16 : vector<1x64x256xf32> to vector<64x256xf32>
    %18 = vector.shape_cast %15 : vector<64x256xf32> to vector<1x64x256xf32>
    tpu.vector_store %arg7[%c0_13, %c0_14, %c0_15], %18 {strides = array<i32>} : memref<1x64x256xf32, #tpu.memory_space<vmem>>, vector<1x64x256xf32>,
    return
  }
  func.func @transform_0(%arg0: i32, %arg1: i32) -> (i32, i32, i32) {
    %c0_i32 = arith.constant 0 : i32
    %c0_i32_0 = arith.constant 0 : i32
    return %arg0, %c0_i32, %arg1 : i32, i32, i32
  }
  func.func @transform_1(%arg0: i32, %arg1: i32) -> (i32, i32) {
    %c0_i32 = arith.constant 0 : i32
    %c0_i32_0 = arith.constant 0 : i32
    %c0_i32_1 = arith.constant 0 : i32
    return %c0_i32, %c0_i32_0 : i32, i32
  }
  func.func @transform_2(%arg0: i32, %arg1: i32) -> (i32, i32) {
    %c0_i32 = arith.constant 0 : i32
    %c0_i32_0 = arith.constant 0 : i32
    %c0_i32_1 = arith.constant 0 : i32
    return %c0_i32, %c0_i32_0 : i32, i32
  }
  func.func @transform_3(%arg0: i32, %arg1: i32) -> (i32, i32) {
    %c0_i32 = arith.constant 0 : i32
    %c0_i32_0 = arith.constant 0 : i32
    %c0_i32_1 = arith.constant 0 : i32
    return %c0_i32, %c0_i32_0 : i32, i32
  }
  func.func @transform_4(%arg0: i32, %arg1: i32) -> (i32, i32) {
    %c0_i32 = arith.constant 0 : i32
    %c0_i32_0 = arith.constant 0 : i32
    %c0_i32_1 = arith.constant 0 : i32
    return %c0_i32, %c0_i32_0 : i32, i32
  }
  func.func @transform_5(%arg0: i32, %arg1: i32) -> (i32, i32, i32) {
    %c0_i32 = arith.constant 0 : i32
    %c0_i32_0 = arith.constant 0 : i32
    return %arg0, %c0_i32, %arg1 : i32, i32, i32
  }
}

</mosaic_0001>

<bundles_post_ra>
// kernel: tpu_custom_call.1
= control target key start
LH: loop header
LB: loop body
LE: loop exit
PB: predicated region body
PF: predicated region fallthrough
CT: control target
= control target key end

     0   :  { %10 = vsyncpa [#allocation3], 0  ;;  %s1288_s0 = inlined_call_operand.vmem [shape: f32[2,3,200], index: 0, kind: input, shape index: {}]   ;;  %s1289_s1 = inlined_call_operand.vmem [shape: f32[64,3], index: 1, kind: input, shape index: {}]   ;;  %s1290_s2 = inlined_call_operand.vmem [shape: f32[64,1], index: 2, kind: input, shape index: {}]   ;;  %s1291_s3 = inlined_call_operand.vmem [shape: f32[64,64], index: 3, kind: input, shape index: {}]   ;;  %s1292_s4 = inlined_call_operand.vmem [shape: f32[64,1], index: 4, kind: input, shape index: {}]   ;;  %s1293_s5 = inlined_call_operand.hbm [shape: f32[2,64,200], index: 5, kind: output, shape index: {}]  }
   0x1   :  { %12 = vsyncpa [#allocation3 + $0x1], 0  ;;  %s1017_s18 = smov 0   ;;  %s1019_s19 = smov 0  }
   0x2   :  { %s1021_s20 = smov 0   ;;  %s1023_s21 = smov 0  }
   0x3   :  { %s1025_s22 = smov 0   ;;  %s1027_s23 = smov 0  }
   0x4 LB: > { %s793_s24 = sadd.s32 4294967295, %s980_s23   ;;  %s794_s25 = sadd.s32 4294967294, %s980_s23   ;;  %s980_s23 = sphi %s1027_s23, %s18_s23   ;;  %s976_s22 = sphi %s1025_s22, %s1300_s22   ;;  %s972_s21 = sphi %s1023_s21, %s1299_s21   ;;  %s968_s20 = sphi %s1021_s20, %s1298_s20   ;;  %s964_s19 = sphi %s1019_s19, %s1297_s19   ;;  %s960_s18 = sphi %s1017_s18, %s1296_s18  }
   0x5   : > { %s30_s26 = sadd.s32 1, %s976_s22  ;;  %s151_s27 = sadd.s32 1, %s968_s20 }
   0x6   : > { %p32_p0 = scmp.ge.s32.totalorder %s30_s26, 2  ;;  %p161_p1 = scmp.ne.s32.totalorder %s968_s20, %s964_s19 }
   0x7   : > { %p162_p2 = scmp.eq.s32.totalorder %s793_s24, 1  ;;  %p167_p3 = scmp.ne.s32.totalorder %s964_s19, %s960_s18 }
   0x8   : > { %s1302_s26 = smov (%p32_p0, %s30_s26), 0  ;;  %p168_p5 = scmp.eq.s32.totalorder %s794_s25, 1 }
   0x9   : > { %p1057_p4 = por %p162_p2, %p161_p1  ;;  %s146_s29 = ssub.s32 %s976_s22, %s1302_s26 }
   0xa   : > { %p797_p6 = scmp.ge.s32.totalorder %s980_s23, 1  ;;  %p149_p7 = scmp.eq.s32.totalorder %s146_s29, 0 }
   0xb   : > { %p1064_p8 = por %p168_p5, %p167_p3  ;;  %p211_p9 = scmp.lt.s32.totalorder %s980_s23, 3 }
   0xc   : > { %s1070_s6 = scalar_select %p149_p7, %s968_s20, %s151_s27  }
   0xd   : > { %p212_p10 = pnand %p797_p6, %p211_p9 }
   0xe   : > { %p244_p11 = scmp.lt.s32.totalorder (!%p212_p10), %s972_s21, 1  ;;  %s240_s16 = sand.u32 (!%p212_p10), 1, %s964_s19  }
   0xf   : > { %215 = sbr.rel (%p212_p10) target bundleno = 510 (0x1fe), region = 40  ;;  %s798_s17 = sshll.u32 (!%p212_p10), %s240_s16, 7 }
  0x10   : > { %s1214_s24 = scalar_lea.vmem (!%p212_p10), [#allocation2], %s798_s17  ;;  %s825_s25 = sshll.u32 (!%p212_p10), %s972_s21, 11 }
  0x11   : > { %s714_s27 = sshll.u32 (!%p212_p10), %s1214_s24, 4  ;;  %s1235_s8 = scalar_lea.hbm (!%p212_p10), %s1293_s5, %s825_s25  ;;  %s1237_s27 = int_to_ptr.vmem [resolvable:$true] %s714_s27 }
  0x12   : > { %s904_s9 = scalar_lea.vmem (!%p212_p10), %s1237_s27, 2048  ;;  %s984_s10 = smov (!%p212_p10), [#allocation2]  }
  0x13   : > { %p905_p12 = scmp.ne.s32.totalorder (!%p212_p10), %s1237_s27, %s904_s9  ;;  %s908_s11 = sshll.u32 (!%p212_p10), %s984_s10, 4  ;;  %s909_s11 = int_to_ptr.vmem [resolvable:$false] %s908_s11 }
  0x14   : > { %v982_v0 = vmov 0.0   ;;  %s245_s7 = scalar_select %p244_p11, %s972_s21, 1  ;;  %v983_v1 = vmov 0   ;;  %v268_v2 = vld [vmem:[%s1290_s2 + $0x28] sm:$0xff]  ;;  %v270_v3 = vld [vmem:[%s1290_s2 + $0x38] sm:$0xff]  ;;  %v267_v4 = vld [vmem:[%s1290_s2 + $0x20] sm:$0xff] }
  0x15   : > { %407 = vmatprep.mubr.f32.mxu0 %v982_v0  ;;  %623 = vmatprep.mubr.f32.mxu1 %v982_v0  ;;  %v269_v5 = vld [vmem:[%s1290_s2 + $0x30] sm:$0xff]  ;;  %vm338_vm0 = vcmask 1042432   ;;  %v254_v8 = vld [vmem:[%s1289_s1] sm:$0xff]  ;;  %vm313_vm1 = vcmask 23552   ;;  %v266_v10 = vld [vmem:[%s1290_s2 + $0x18] sm:$0xff]  ;;  %vm528_vm2 = vcmask 523264   ;;  %p906_p13 = pnand %p905_p12, %p1057_p4  ;;  %p911_p1 = scmp.lt.s32.totalorder %s1237_s27, %s909_s11 }
  0x16   : > { %902 = vset.pattern.permute.xlu1 %v983_v1  ;;  %901 = vset.pattern.permute.xlu0 %v983_v1  ;;  %s824_s12 = sshll.u32 %s245_s7, 3  ;;  %v265_v9 = vld [vmem:[%s1290_s2 + $0x10] sm:$0xff]  ;;  %v255_v11 = vld [vmem:[%s1289_s1 + $0x8] sm:$0xff]  ;;  %v263_v12 = vld [vmem:[%s1290_s2] sm:$0xff]  ;;  %s1243_s21 = scalar_lea.sflag [#allocation3], %s240_s16 }
  0x17   : > { %298 = vperm.xlu1 %902, %v268_v2   ;;  %308 = vperm.xlu0 %901, %v270_v3   ;;  %s251_s15 = scalar_lea.vmem %s1288_s0, %s824_s12  ;;  %v264_v13 = vld [vmem:[%s1290_s2 + $0x8] sm:$0xff]  ;;  %v256_v14 = vld [vmem:[%s1289_s1 + $0x10] sm:$0xff]  ;;  %v480_v16 = vld [vmem:[%s1292_s4] sm:$0xff]  ;;  %p907_p0 = pneg %p906_p13 }
  0x18   : > { %v262_v6 = vld [vmem:[%s251_s15] sm:$0x77]  ;;  %v481_v15 = vld [vmem:[%s1292_s4 + $0x8] sm:$0xff]  ;;  %v257_v17 = vld [vmem:[%s1289_s1 + $0x18] sm:$0xff]  ;;  %s910_s12 = scalar_lea.vmem %s909_s11, 4096 }
  0x19   : > { %v312_v7 = vcombine.high %v262_v6, %v262_v6  ;;  %v483_v18 = vld [vmem:[%s1292_s4 + $0x18] sm:$0xff]  ;;  %v482_v19 = vld [vmem:[%s1292_s4 + $0x10] sm:$0xff]  ;;  %v258_v20 = vld [vmem:[%s1289_s1 + $0x20] sm:$0xff]  ;;  %p912_p2 = scmp.lt.s32.totalorder %s910_s12, %s904_s9 }
  0x1a   : > { %v485_v21 = vld [vmem:[%s1292_s4 + $0x28] sm:$0xff]  ;;  %v484_v22 = vld [vmem:[%s1292_s4 + $0x20] sm:$0xff]  ;;  %v487_v24 = vld [vmem:[%s1292_s4 + $0x38] sm:$0xff] }
  0x1b   : > { %293 = vperm.xlu1 %902, %v267_v4   ;;  %303 = vperm.xlu0 %901, %v269_v5   ;;  %v259_v23 = vld [vmem:[%s1289_s1 + $0x28] sm:$0xff]  ;;  %v486_v25 = vld [vmem:[%s1292_s4 + $0x30] sm:$0xff]  ;;  %v261_v27 = vld [vmem:[%s1289_s1 + $0x38] sm:$0xff]  ;;  %p913_p3 = por %p912_p2, %p911_p1 }
  0x1c   : > { %801 = vmatprep.subr.msk.mxu0 %vm338_vm0, %v312_v7  ;;  %v260_v26 = vld [vmem:[%s1289_s1 + $0x30] sm:$0xff] }
  0x1d   : > { %802 = vmatpush1.msk.msra.mxu0 %vm338_vm0, %v262_v6  ;;  %p914_p5 = pnand %p913_p3, %p907_p0 }
  0x1e   : > { %803 = vmatmul.mubr.msk.f32.vlgmr.msra.gmra.mxu0 %vm313_vm1, %v254_v8 }
  0x1f   : > { %413 = vmatprep.mubr.f32.mxu0 %v982_v0  ;;  %283 = vperm.xlu1 %902, %v265_v9  }
  0x20   : > { %288 = vperm.xlu0 %901, %v266_v10  }
  0x22   : > { %804 = vmatmul.mubr.msk.f32.gmra.mxu0 %vm313_vm1, %v255_v11 }
  0x23   : > { %419 = vmatprep.mubr.f32.mxu0 %v982_v0  ;;  %273 = vperm.xlu1 %902, %v263_v12  }
  0x24   : > { %278 = vperm.xlu0 %901, %v264_v13  }
  0x26   : > { %805 = vmatmul.mubr.msk.f32.gmra.mxu0 %vm313_vm1, %v256_v14 }
  0x27   : > { %425 = vmatprep.mubr.f32.mxu0 %v982_v0  ;;  %495 = vperm.xlu1 %902, %v481_v15  }
  0x28   : > { %490 = vperm.xlu0 %901, %v480_v16  }
  0x2a   : > { %806 = vmatmul.mubr.msk.f32.gmra.mxu0 %vm313_vm1, %v257_v17 }
  0x2b   : > { %431 = vmatprep.mubr.f32.mxu0 %v982_v0  ;;  %505 = vperm.xlu1 %902, %v483_v18  }
  0x2c   : > { %500 = vperm.xlu0 %901, %v482_v19  }
  0x2e   : > { %807 = vmatmul.mubr.msk.f32.gmra.mxu0 %vm313_vm1, %v258_v20 }
  0x2f   : > { %437 = vmatprep.mubr.f32.mxu0 %v982_v0  ;;  %515 = vperm.xlu1 %902, %v485_v21   ;;  %v472_v21 = vld [vmem:[%s1291_s3] sm:$0xff] }
  0x30   : > { %510 = vperm.xlu0 %901, %v484_v22   ;;  %v473_v22 = vld [vmem:[%s1291_s3 + $0x8] sm:$0xff] }
  0x32   : > { %808 = vmatmul.mubr.msk.f32.gmra.mxu0 %vm313_vm1, %v259_v23  ;;  %v474_v23 = vld [vmem:[%s1291_s3 + $0x10] sm:$0xff] }
  0x33   : > { %443 = vmatprep.mubr.f32.mxu0 %v982_v0  ;;  %525 = vperm.xlu1 %902, %v487_v24   ;;  %v475_v24 = vld [vmem:[%s1291_s3 + $0x18] sm:$0xff] }
  0x34   : > { %520 = vperm.xlu0 %901, %v486_v25   ;;  %v476_v25 = vld [vmem:[%s1291_s3 + $0x20] sm:$0xff] }
  0x36   : > { %809 = vmatmul.mubr.msk.f32.gmra.mxu0 %vm313_vm1, %v260_v26  ;;  %v477_v26 = vld [vmem:[%s1291_s3 + $0x28] sm:$0xff] }
  0x37   : > { %449 = vmatprep.mubr.f32.mxu0 %v982_v0 }
  0x3a   : > { %810 = vmatmul.mubr.msk.f32.gmra.mxu0 %vm313_vm1, %v261_v27  ;;  %v478_v27 = vld [vmem:[%s1291_s3 + $0x30] sm:$0xff] }
  0x3b   : > { %617 = vmatprep.mubr.f32.mxu0 %v982_v0 }
  0x92   : > { %v309_v39 = vpop.permute.xlu0 %308  ;;  %v299_v41 = vpop.permute.xlu1 %298 }
  0x96   : > { %v304_v44 = vpop.permute.xlu0 %303  ;;  %v294_v46 = vpop.permute.xlu1 %293 }
  0x9a   : > { %v284_v57 = vpop.permute.xlu1 %283 }
  0x9b   : > { %v289_v52 = vpop.permute.xlu0 %288 }
  0x9e   : > { %v274_v8 = vpop.permute.xlu1 %273 }
  0x9f   : > { %v279_v3 = vpop.permute.xlu0 %278 }
  0xde   : > { %v1167_v28 = vpop.f32.mrf.mxu0 }
  0xdf   : > { %v410_v15 = vadd.f32 %v1167_v28, %v274_v8  ;;  %v479_v28 = vld [vmem:[%s1291_s3 + $0x38] sm:$0xff] }
  0xe0   : > { %v1169_v29 = vpop.f32.mrf.mxu0 }
  0xe1   : > { %v412_v13 = vadd.f32 %v1169_v29, %v274_v8  ;;  %v456_v20 = vmax.f32 %v410_v15, 0.0  ;;  %v491_v29 = vpop.permute.xlu0 %490 }
  0xe2   : > { %v415_v30 = vpop.f32.mrf.mxu0 }
  0xe3   : > { %v416_v11 = vadd.f32 %v415_v30, %v279_v3  ;;  %v457_v19 = vmax.f32 %v412_v13, 0.0  ;;  %v496_v30 = vpop.permute.xlu1 %495 }
  0xe4   : > { %v417_v31 = vpop.f32.mrf.mxu0 }
  0xe5   : > { %v418_v9 = vadd.f32 %v417_v31, %v279_v3  ;;  %v458_v18 = vmax.f32 %v416_v11, 0.0 }
  0xe6   : > { %v421_v32 = vpop.f32.mrf.mxu0 }
  0xe7   : > { %v422_v6 = vadd.f32 %v421_v32, %v284_v57  ;;  %v459_v17 = vmax.f32 %v418_v9, 0.0 }
  0xe8   : > { %v423_v33 = vpop.f32.mrf.mxu0 }
  0xe9   : > { %v424_v4 = vadd.f32 %v423_v33, %v284_v57  ;;  %v460_v16 = vmax.f32 %v422_v6, 0.0 }
  0xea   : > { %v427_v34 = vpop.f32.mrf.mxu0 }
  0xeb   : > { %v428_v1 = vadd.f32 %v427_v34, %v289_v52  ;;  %v461_v14 = vmax.f32 %v424_v4, 0.0 }
  0xec   : > { %v429_v35 = vpop.f32.mrf.mxu0 }
  0xed   : > { %v430_v62 = vadd.f32 %v429_v35, %v289_v52  ;;  %v462_v12 = vmax.f32 %v428_v1, 0.0 }
  0xee   : > { %v433_v36 = vpop.f32.mrf.mxu0 }
  0xef   : > { %v434_v60 = vadd.f32 %v433_v36, %v294_v46  ;;  %v463_v10 = vmax.f32 %v430_v62, 0.0 }
  0xf0   : > { %v435_v37 = vpop.f32.mrf.mxu0 }
  0xf1   : > { %v436_v58 = vadd.f32 %v435_v37, %v294_v46  ;;  %v464_v7 = vmax.f32 %v434_v60, 0.0 }
  0xf2   : > { %v439_v38 = vpop.f32.mrf.mxu0 }
  0xf3   : > { %v440_v55 = vadd.f32 %v439_v38, %v299_v41  ;;  %v465_v5 = vmax.f32 %v436_v58, 0.0 }
  0xf4   : > { %v441_v40 = vpop.f32.mrf.mxu0 }
  0xf5   : > { %v442_v53 = vadd.f32 %v441_v40, %v299_v41  ;;  %v466_v2 = vmax.f32 %v440_v55, 0.0  ;;  %v501_v40 = vpop.permute.xlu0 %500 }
  0xf6   : > { %v445_v42 = vpop.f32.mrf.mxu0 }
  0xf7   : > { %v446_v51 = vadd.f32 %v445_v42, %v304_v44  ;;  %v467_v63 = vmax.f32 %v442_v53, 0.0 }
  0xf8   : > { %v447_v43 = vpop.f32.mrf.mxu0 }
  0xf9   : > { %v448_v49 = vadd.f32 %v447_v43, %v304_v44  ;;  %v468_v61 = vmax.f32 %v446_v51, 0.0  ;;  %v511_v55 = vpop.permute.xlu0 %510 }
  0xfa   : > { %v451_v45 = vpop.f32.mrf.mxu0 }
  0xfb   : > { %v452_v47 = vadd.f32 %v451_v45, %v309_v39  ;;  %v469_v59 = vmax.f32 %v448_v49, 0.0 }
  0xfc   : > { %v453_v48 = vpop.f32.mrf.mxu0 }
  0xfd   : > { %v454_v50 = vadd.f32 %v453_v48, %v309_v39  ;;  %v470_v56 = vmax.f32 %v452_v47, 0.0  ;;  %v506_v48 = vpop.permute.xlu1 %505  ;;  %v521_v6 = vpop.permute.xlu0 %520 }
  0xff   : > { %v471_v54 = vmax.f32 %v454_v50, 0.0 }
 0x101   : > { %569 = vmatprep.subr.mxu0 %v471_v54  ;;  %826 = vmatprep.subr.mxu1 %v471_v54  ;;  %v516_v62 = vpop.permute.xlu1 %515 }
 0x102   : > { %570 = vmatpush1.msra.mxu0 %v470_v56  ;;  %834 = vmatpush1.msra.mxu1 %v470_v56 }
 0x103   : > { %571 = vmatprep.subr.mxu0 %v469_v59  ;;  %827 = vmatprep.subr.mxu1 %v469_v59 }
 0x104   : > { %572 = vmatpush1.msra.mxu0 %v468_v61  ;;  %835 = vmatpush1.msra.mxu1 %v468_v61 }
 0x105   : > { %573 = vmatprep.subr.mxu0 %v467_v63  ;;  %828 = vmatprep.subr.mxu1 %v467_v63  ;;  %v526_v13 = vpop.permute.xlu1 %525 }
 0x106   : > { %574 = vmatpush1.msra.mxu0 %v466_v2  ;;  %836 = vmatpush1.msra.mxu1 %v466_v2 }
 0x107   : > { %575 = vmatprep.subr.mxu0 %v465_v5  ;;  %829 = vmatprep.subr.mxu1 %v465_v5 }
 0x108   : > { %576 = vmatpush1.msra.mxu0 %v464_v7  ;;  %837 = vmatpush1.msra.mxu1 %v464_v7 }
 0x109   : > { %577 = vmatprep.subr.mxu0 %v463_v10  ;;  %830 = vmatprep.subr.mxu1 %v463_v10 }
 0x10a   : > { %578 = vmatpush1.msra.mxu0 %v462_v12  ;;  %838 = vmatpush1.msra.mxu1 %v462_v12 }
 0x10b   : > { %579 = vmatprep.subr.mxu0 %v461_v14  ;;  %831 = vmatprep.subr.mxu1 %v461_v14 }
 0x10c   : > { %580 = vmatpush1.msra.mxu0 %v460_v16  ;;  %839 = vmatpush1.msra.mxu1 %v460_v16 }
 0x10d   : > { %581 = vmatprep.subr.mxu0 %v459_v17  ;;  %832 = vmatprep.subr.mxu1 %v459_v17 }
 0x10e   : > { %582 = vmatpush1.msra.mxu0 %v458_v18  ;;  %840 = vmatpush1.msra.mxu1 %v458_v18 }
 0x10f   : > { %583 = vmatprep.subr.mxu0 %v457_v19  ;;  %833 = vmatprep.subr.mxu1 %v457_v19 }
 0x110   : > { %584 = vmatpush1.msra.mxu0 %v456_v20  ;;  %841 = vmatpush1.msra.mxu1 %v456_v20 }
 0x111   : > { %811 = vmatmul.mubr.msk.f32.vlgmr.msra.gmra.mxu0 %vm528_vm2, %v472_v21  ;;  %812 = vmatmul.mubr.msk.f32.vlgmr.msra.gmra.mxu1 %vm528_vm2, %v473_v22 }
 0x112   : > { %629 = vmatprep.mubr.f32.mxu1 %v982_v0 }
 0x115   : > { %813 = vmatmul.mubr.msk.f32.gmra.mxu1 %vm528_vm2, %v474_v23 }
 0x116   : > { %635 = vmatprep.mubr.f32.mxu1 %v982_v0 }
 0x119   : > { %814 = vmatmul.mubr.msk.f32.gmra.mxu1 %vm528_vm2, %v475_v24 }
 0x11a   : > { %641 = vmatprep.mubr.f32.mxu1 %v982_v0 }
 0x11d   : > { %815 = vmatmul.mubr.msk.f32.gmra.mxu1 %vm528_vm2, %v476_v25 }
 0x11e   : > { %647 = vmatprep.mubr.f32.mxu1 %v982_v0 }
 0x121   : > { %816 = vmatmul.mubr.msk.f32.gmra.mxu1 %vm528_vm2, %v477_v26 }
 0x122   : > { %653 = vmatprep.mubr.f32.mxu1 %v982_v0 }
 0x125   : > { %817 = vmatmul.mubr.msk.f32.gmra.mxu1 %vm528_vm2, %v478_v27 }
 0x126   : > { %659 = vmatprep.mubr.f32.mxu1 %v982_v0 }
 0x129   : > { %818 = vmatmul.mubr.msk.f32.gmra.mxu1 %vm528_vm2, %v479_v28 }
 0x1d1   : > { %v619_v31 = vpop.f32.mrf.mxu0  ;;  %v625_v32 = vpop.f32.mrf.mxu1 }
 0x1d2   : > { %v620_v33 = vadd.f32 %v619_v31, %v491_v29  ;;  %v626_v34 = vadd.f32 %v625_v32, %v496_v30 }
 0x1d3   : > { %v621_v35 = vpop.f32.mrf.mxu0  ;;  %v627_v36 = vpop.f32.mrf.mxu1 }
 0x1d4   : > { %v666_v37 = vmax.f32 %v620_v33, 0.0  ;;  %v668_v38 = vmax.f32 %v626_v34, 0.0  ;;  %v622_v0 = vadd.f32 %v621_v35, %v491_v29  ;;  %v628_v39 = vadd.f32 %v627_v36, %v496_v30 }
 0x1d5   : > { %v631_v41 = vpop.f32.mrf.mxu1 }
 0x1d6   : > { %682 = vst [vmem:[%s1214_s24] sm:$0xff] %v666_v37  ;;  %684 = vst [vmem:[%s1214_s24 + $0x10] sm:$0xff] %v668_v38  ;;  %v667_v42 = vmax.f32 %v622_v0, 0.0  ;;  %v669_v43 = vmax.f32 %v628_v39, 0.0  ;;  %v632_v44 = vadd.f32 %v631_v41, %v501_v40 }
 0x1d7   : > { %v633_v45 = vpop.f32.mrf.mxu1 }
 0x1d8   : > { %683 = vst [vmem:[%s1214_s24 + $0x8] sm:$0xff] %v667_v42  ;;  %685 = vst [vmem:[%s1214_s24 + $0x18] sm:$0xff] %v669_v43  ;;  %v670_v46 = vmax.f32 %v632_v44, 0.0  ;;  %v634_v47 = vadd.f32 %v633_v45, %v501_v40 }
 0x1d9   : > { %v637_v49 = vpop.f32.mrf.mxu1 }
 0x1da   : > { %686 = vst [vmem:[%s1214_s24 + $0x20] sm:$0xff] %v670_v46  ;;  %v671_v50 = vmax.f32 %v634_v47, 0.0  ;;  %v638_v51 = vadd.f32 %v637_v49, %v506_v48 }
 0x1db   : > { %v639_v52 = vpop.f32.mrf.mxu1 }
 0x1dc   : > { %687 = vst [vmem:[%s1214_s24 + $0x28] sm:$0xff] %v671_v50  ;;  %v672_v53 = vmax.f32 %v638_v51, 0.0  ;;  %v640_v54 = vadd.f32 %v639_v52, %v506_v48 }
 0x1dd   : > { %v643_v56 = vpop.f32.mrf.mxu1 }
 0x1de   : > { %688 = vst [vmem:[%s1214_s24 + $0x30] sm:$0xff] %v672_v53  ;;  %v673_v57 = vmax.f32 %v640_v54, 0.0  ;;  %v644_v58 = vadd.f32 %v643_v56, %v511_v55 }
 0x1df   : > { %v645_v59 = vpop.f32.mrf.mxu1 }
 0x1e0   : > { %689 = vst [vmem:[%s1214_s24 + $0x38] sm:$0xff] %v673_v57  ;;  %v674_v60 = vmax.f32 %v644_v58, 0.0  ;;  %v646_v61 = vadd.f32 %v645_v59, %v511_v55 }
 0x1e1   : > { %v649_v63 = vpop.f32.mrf.mxu1 }
 0x1e2   : > { %690 = vst [vmem:[%s1214_s24 + $0x40] sm:$0xff] %v674_v60  ;;  %v675_v1 = vmax.f32 %v646_v61, 0.0  ;;  %v650_v2 = vadd.f32 %v649_v63, %v516_v62 }
 0x1e3   : > { %v651_v3 = vpop.f32.mrf.mxu1 }
 0x1e4   : > { %691 = vst [vmem:[%s1214_s24 + $0x48] sm:$0xff] %v675_v1  ;;  %v676_v4 = vmax.f32 %v650_v2, 0.0  ;;  %v652_v5 = vadd.f32 %v651_v3, %v516_v62 }
 0x1e5   : > { %v655_v7 = vpop.f32.mrf.mxu1 }
 0x1e6   : > { %692 = vst [vmem:[%s1214_s24 + $0x50] sm:$0xff] %v676_v4  ;;  %v677_v8 = vmax.f32 %v652_v5, 0.0  ;;  %v656_v9 = vadd.f32 %v655_v7, %v521_v6 }
 0x1e7   : > { %v657_v10 = vpop.f32.mrf.mxu1 }
 0x1e8   : > { %693 = vst [vmem:[%s1214_s24 + $0x58] sm:$0xff] %v677_v8  ;;  %v678_v11 = vmax.f32 %v656_v9, 0.0  ;;  %v658_v12 = vadd.f32 %v657_v10, %v521_v6 }
 0x1e9   : > { %v661_v14 = vpop.f32.mrf.mxu1 }
 0x1ea   : > { %694 = vst [vmem:[%s1214_s24 + $0x60] sm:$0xff] %v678_v11  ;;  %v679_v15 = vmax.f32 %v658_v12, 0.0  ;;  %v662_v16 = vadd.f32 %v661_v14, %v526_v13 }
 0x1eb   : > { %v663_v17 = vpop.f32.mrf.mxu1 }
 0x1ec   : > { %695 = vst [vmem:[%s1214_s24 + $0x68] sm:$0xff] %v679_v15  ;;  %v680_v18 = vmax.f32 %v662_v16, 0.0  ;;  %v664_v19 = vadd.f32 %v663_v17, %v526_v13 }
 0x1ee   : > { %696 = vst [vmem:[%s1214_s24 + $0x70] sm:$0xff] %v680_v18  ;;  %v681_v20 = vmax.f32 %v664_v19, 0.0 }
 0x1f0   : > { %697 = vst [vmem:[%s1214_s24 + $0x78] sm:$0xff] %v681_v20 }
 0x1f1   : > { %917 = shalt.err (!%p914_p5)
}
 0x1f2   : > { %s918_s13 = scalar_lea.hbm %s1235_s8, 2048  ;;  %s922_s16 = scalar_lea.hbm %s1293_s5, 4096 }
 0x1f3   : > { %p919_p6 = scmp.ne.s32.totalorder %s1235_s8, %s918_s13  ;;  %p923_p10 = scmp.lt.s32.totalorder %s1235_s8, %s1293_s5 }
 0x1f4   : > { %p924_p11 = scmp.lt.s32.totalorder %s922_s16, %s918_s13 }
 0x1f5   : > { %p920_p7 = pnand %p919_p6, %p1057_p4 }
 0x1f6   : > { %p925_p12 = por %p924_p11, %p923_p10 }
 0x1f7   : > { %p921_p9 = pneg %p920_p7 }
 0x1f9   : > { %p926_p13 = pnand %p925_p12, %p921_p9 }
 0x1fb   : > { %929 = shalt.err (!%p926_p13)
}
 0x1fc   : > { %s985_s25 = smov 256   ;;  %s986_s29 = smov 16  }
 0x1fd   : > { %842 = dma.vmem_to_hbm [thread:$0]  (%p1057_p4), %s1237_s27, 2048, %s1235_s8, %s1243_s21, %s985_s25, %s985_s25, %s986_s29  }
 0x1fe PF: > { %p848_p0 = scmp.ge.s32.totalorder %s980_s23, 2  ;;  %s729_s7 = sand.u32 1, %s960_s18  }
 0x1ff   : > { %s730_s9 = scalar_lea.sflag [#allocation3], %s729_s7 }
 0x200   : > { %p845_p1 = pnand %p848_p0, %p1064_p8 }
 0x202   : > { %p846_p2 = pneg %p845_p1 }
 0x204   : > { %955 = dma.done.wait (%p846_p2), %s730_s9, 2048  }
 0x205   : > { %957 = vsyncadd (%p846_p2), %s730_s9, 4294965248  ;;  %s18_s23 = sadd.s32 1, %s980_s23   ;;  %s1296_s18 = smov %s964_s19 }
 0x206   : > { %p15_p3 = scmp.ge.s32.totalorder %s18_s23, 4   ;;  %s1297_s19 = smov %s968_s20 }
 0x207   : > { %s1298_s20 = smov %s1070_s6  ;;  %s1299_s21 = smov %s976_s22 }
 0x208   : > { %s1300_s22 = smov %s1302_s26  ;;  %17 = sbr.rel (!%p15_p3) target bundleno = 4 (0x4), region = 75 }
 0x20d   :  { %735 = vsyncpa [#allocation3], 1 }
 0x20e   :  { %737 = vsyncpa [#allocation3 + $0x1], 1 }

</bundles_post_ra>
